<compile_context>
chip_gen: v7x
topology: tpu7x:2x2x1
jax: 0.10.0
libtpu: 0.0.40
codegen_flags: <defaults>
</compile_context>

<pallas_src>
import functools
import math

import jax
import jax.numpy as jnp
from jax.experimental import pallas as pl
from jax.experimental.pallas import tpu as pltpu

BN_EPS = 1e-5


def _head_kernel(inv_n, x_ref, wb_ref, gamma_ref, beta_ref, wfc_ref, bfc_ref,
                 xbn_ref, y_ref, sum_ref, sq_ref):
    """grid = (2, num_row_tiles); pass axis is the slow (outer) axis.

    pass 0 (p == 0): h = x_tile @ Wb (bf16 operands, f32 accum); accumulate
                     per-column sum and sum-of-squares into VMEM scratch.
    pass 1 (p == 1): recompute h, fold BN into scale/shift, normalize, fc matmul,
                     store lane-dense outputs.
    """
    p = pl.program_id(0)
    t = pl.program_id(1)

    # Bottleneck matmul, shared by both passes.  The bottleneck bias is omitted:
    # a per-column constant added before train-mode BN cancels in (h - mean).
    x = x_ref[...].astype(jnp.bfloat16)
    h = jnp.dot(x, wb_ref[...], preferred_element_type=jnp.float32)

    @pl.when(jnp.logical_and(p == 0, t == 0))
    def _init():
        sum_ref[...] = jnp.zeros_like(sum_ref)
        sq_ref[...] = jnp.zeros_like(sq_ref)

    @pl.when(p == 0)
    def _accumulate_stats():
        sum_ref[...] += jnp.sum(h, axis=0, keepdims=True)
        sq_ref[...] += jnp.sum(h * h, axis=0, keepdims=True)

    @pl.when(p == 1)
    def _normalize_and_fc():
        mean = sum_ref[...] * inv_n                                   # (1, Dbn)
        var = jnp.maximum(sq_ref[...] * inv_n - mean * mean, 0.0)     # biased var
        inv_std = jax.lax.rsqrt(var + BN_EPS)
        scale = gamma_ref[...] * inv_std                              # (1, Dbn)
        shift = beta_ref[...] - mean * scale                          # (1, Dbn)
        x_bn = h * scale + shift                                      # (tn, Dbn) f32
        xbn_ref[...] = x_bn.astype(xbn_ref.dtype)
        y = jnp.dot(x_bn.astype(jnp.bfloat16), wfc_ref[...],
                    preferred_element_type=jnp.float32) + bfc_ref[...]
        y_ref[...] = y.astype(y_ref.dtype)


def res_classifier_bn(x, wb, bb, gamma, beta, wfc, bfc, *, block_rows=1024):
    """Forward of the bottleneck -> BN(train) -> fc head as one Pallas kernel.

    `bb` is accepted for parity with the PyTorch module but not sent to the
    kernel: it cancels exactly under train-mode batch-norm mean subtraction.
    Weights are stored transposed vs. PyTorch, i.e. (in_dim, out_dim).
    """
    del bb  # mathematically a no-op before train-mode BN
    N, F = x.shape
    Dbn = wb.shape[1]
    C = wfc.shape[1]

    # Row tile: largest power-of-two divisor of N up to block_rows (>= 8 sublanes);
    # fall back to the whole batch if N is not 8-aligned.
    tn = min(block_rows, N)
    while tn > 8 and N % tn != 0:
        tn //= 2
    if N % tn != 0:
        tn = N
    nt = N // tn

    # Lane-dense fc output: pad the class dim to a multiple of 128 so the final
    # store is an unmasked full-lane vst; slice back to C in the wrapper.
    c_pad = ((C + 127) // 128) * 128
    wfc_p = jnp.pad(wfc, ((0, 0), (0, c_pad - C))).astype(jnp.bfloat16)
    bfc_p = jnp.pad(bfc, ((0, 0), (0, c_pad - C))).astype(jnp.float32)
    wb_bf = wb.astype(jnp.bfloat16)
    gamma_f = gamma.astype(jnp.float32)
    beta_f = beta.astype(jnp.float32)

    kernel = functools.partial(_head_kernel, 1.0 / N)

    grid_spec = pltpu.PrefetchScalarGridSpec(
        num_scalar_prefetch=0,
        grid=(2, nt),                                          # (pass, row tile)
        in_specs=[
            pl.BlockSpec((tn, F), lambda p, t: (t, 0)),        # x row tile
            pl.BlockSpec((F, Dbn), lambda p, t: (0, 0)),       # Wb (resident, bf16)
            pl.BlockSpec((1, Dbn), lambda p, t: (0, 0)),       # gamma
            pl.BlockSpec((1, Dbn), lambda p, t: (0, 0)),       # beta
            pl.BlockSpec((Dbn, c_pad), lambda p, t: (0, 0)),   # Wfc (padded, bf16)
            pl.BlockSpec((1, c_pad), lambda p, t: (0, 0)),     # bfc (padded)
        ],
        out_specs=(
            pl.BlockSpec((tn, Dbn), lambda p, t: (t, 0)),      # x_bn
            pl.BlockSpec((tn, c_pad), lambda p, t: (t, 0)),    # y (lane-dense)
        ),
        scratch_shapes=[
            pltpu.VMEM((1, Dbn), jnp.float32),                 # sum(h)
            pltpu.VMEM((1, Dbn), jnp.float32),                 # sum(h*h)
        ],
    )

    x_bn, y_pad = pl.pallas_call(
        kernel,
        out_shape=(jax.ShapeDtypeStruct((N, Dbn), jnp.float32),
                   jax.ShapeDtypeStruct((N, c_pad), jnp.float32)),
        grid_spec=grid_spec,
        compiler_params=pltpu.CompilerParams(
            # Both axes 'arbitrary': pass 0 accumulates global BN stats in VMEM
            # scratch across tiles and outputs are revisited in pass 1, so
            # megacore sharding of either axis would be incorrect.
            dimension_semantics=("arbitrary", "arbitrary"),
            vmem_limit_bytes=48 * 1024 * 1024,
        ),
    )(x, wb_bf, gamma_f, beta_f, wfc_p, bfc_p)

    return x_bn, y_pad[:, :C]


def init_params(key, class_num, feature_dim, bottleneck_dim=256):
    """Deterministic init mirroring init_weights(): Linear -> xavier_normal
    weight + zero bias; BatchNorm -> weight ~ N(1, 0.02), zero bias."""
    k1, k2, k3 = jax.random.split(key, 3)
    std_b = math.sqrt(2.0 / (feature_dim + bottleneck_dim))
    wb = std_b * jax.random.normal(k1, (feature_dim, bottleneck_dim), jnp.float32)
    bb = jnp.zeros((1, bottleneck_dim), jnp.float32)
    std_fc = math.sqrt(2.0 / (bottleneck_dim + class_num))
    wfc = std_fc * jax.random.normal(k2, (bottleneck_dim, class_num), jnp.float32)
    bfc = jnp.zeros((1, class_num), jnp.float32)
    gamma = 1.0 + 0.02 * jax.random.normal(k3, (1, bottleneck_dim), jnp.float32)
    beta = jnp.zeros((1, bottleneck_dim), jnp.float32)
    return wb, bb, gamma, beta, wfc, bfc


def reference_forward(x, wb, bb, gamma, beta, wfc, bfc):
    """Pure-JAX reference with the same bf16-operand / f32-accumulate matmul
    policy as the kernel (all BN math in f32, biased train-mode variance)."""
    h = jnp.dot(x.astype(jnp.bfloat16), wb.astype(jnp.bfloat16),
                preferred_element_type=jnp.float32) + bb
    mean = jnp.mean(h, axis=0, keepdims=True)
    var = jnp.mean((h - mean) ** 2, axis=0, keepdims=True)
    x_bn = (h - mean) / jnp.sqrt(var + BN_EPS) * gamma + beta
    y = jnp.dot(x_bn.astype(jnp.bfloat16), wfc.astype(jnp.bfloat16),
                preferred_element_type=jnp.float32) + bfc
    return x_bn, y


if __name__ == "__main__":
    class_num = 10
    feature_dim = 128
    bottleneck_dim = 256
    batch = 32

    key = jax.random.PRNGKey(0)
    kx, kp = jax.random.split(key)
    x = jax.random.normal(kx, (batch, feature_dim), jnp.float32)
    params = init_params(kp, class_num, feature_dim, bottleneck_dim)

    x_bn_ref, y_ref = reference_forward(x, *params)

    # Multi-tile path: 4 row tiles of 8 -> grid (2 passes, 4 tiles).
    x_bn_mt, y_mt = res_classifier_bn(x, *params, block_rows=8)
    # Single-tile path: whole batch in one block -> grid (2, 1).
    x_bn_st, y_st = res_classifier_bn(x, *params)
    jax.block_until_ready((x_bn_mt, y_mt, x_bn_st, y_st))

    assert x_bn_mt.shape == (batch, bottleneck_dim)
    assert y_mt.shape == (batch, class_num)
    for got_xbn, got_y in ((x_bn_mt, y_mt), (x_bn_st, y_st)):
        assert jnp.allclose(got_xbn, x_bn_ref, atol=1e-2, rtol=1e-2), \
            float(jnp.max(jnp.abs(got_xbn - x_bn_ref)))
        assert jnp.allclose(got_y, y_ref, atol=1e-2, rtol=1e-2), \
            float(jnp.max(jnp.abs(got_y - y_ref)))

    print("KERNEL_OK")
</pallas_src>

<mosaic_0001>
module attributes {stable_mosaic.version = 11 : i64} {
  func.func @_head_kernel(%arg0: i32, %arg1: i32, %arg2: memref<8x128xf32, #tpu.memory_space<vmem>>, %arg3: memref<128x256xbf16, #tpu.memory_space<vmem>>, %arg4: memref<1x256xf32, #tpu.memory_space<vmem>>, %arg5: memref<1x256xf32, #tpu.memory_space<vmem>>, %arg6: memref<256x128xbf16, #tpu.memory_space<vmem>>, %arg7: memref<1x128xf32, #tpu.memory_space<vmem>>, %arg8: memref<8x256xf32, #tpu.memory_space<vmem>>, %arg9: memref<8x128xf32, #tpu.memory_space<vmem>>, %arg10: memref<1x256xf32, #tpu.memory_space<vmem>>, %arg11: memref<1x256xf32, #tpu.memory_space<vmem>>) attributes {dimension_semantics = [#tpu.dimension_semantics<arbitrary>, #tpu.dimension_semantics<arbitrary>], iteration_bounds = array<i64: 2, 4>, scalar_prefetch = 0 : i64, scratch_operands = 2 : i64, tpu.core_type = #tpu.core_type<tc>, window_params = [{transform_indices = @transform_0, window_bounds = array<i64: 8, 128>}, {pipeline_mode = #tpu.pipeline_mode<synchronous>, transform_indices = @transform_1, window_bounds = array<i64: 128, 256>}, {pipeline_mode = #tpu.pipeline_mode<synchronous>, transform_indices = @transform_2, window_bounds = array<i64: 1, 256>}, {pipeline_mode = #tpu.pipeline_mode<synchronous>, transform_indices = @transform_3, window_bounds = array<i64: 1, 256>}, {pipeline_mode = #tpu.pipeline_mode<synchronous>, transform_indices = @transform_4, window_bounds = array<i64: 256, 128>}, {pipeline_mode = #tpu.pipeline_mode<synchronous>, transform_indices = @transform_5, window_bounds = array<i64: 1, 128>}, {transform_indices = @transform_6, window_bounds = array<i64: 8, 256>}, {transform_indices = @transform_7, window_bounds = array<i64: 8, 128>}]} {
    %c0 = arith.constant 0 : index
    %c0_0 = arith.constant 0 : index
    %0 = vector.load %arg2[%c0, %c0_0] : memref<8x128xf32, #tpu.memory_space<vmem>>, vector<8x128xf32>
    %1 = arith.truncf %0 : vector<8x128xf32> to vector<8x128xbf16>
    %c0_1 = arith.constant 0 : index
    %c0_2 = arith.constant 0 : index
    %2 = vector.load %arg3[%c0_1, %c0_2] : memref<128x256xbf16, #tpu.memory_space<vmem>>, vector<128x256xbf16>
    %cst = arith.constant dense<0.000000e+00> : vector<8x256xf32>
    %3 = tpu.matmul %1, %2, %cst {dimension_numbers = #tpu.dot_dimension_numbers<[1], [0], [0], [1], [0, 0, 1, 1], [], []>} : vector<8x128xbf16>, vector<128x256xbf16>, vector<8x256xf32> -> vector<8x256xf32>
    %c0_i32 = arith.constant 0 : i32
    %4 = arith.cmpi eq, %arg0, %c0_i32 : i32
    %c0_i32_3 = arith.constant 0 : i32
    %5 = arith.cmpi eq, %arg1, %c0_i32_3 : i32
    %6 = arith.andi %4, %5 : i1
    %7 = arith.extui %6 : i1 to i32
    %c0_i32_4 = arith.constant 0 : i32
    %8 = arith.cmpi ne, %7, %c0_i32_4 : i32
    scf.if %8 {
      %cst_8 = arith.constant 0.000000e+00 : f32
      %15 = vector.broadcast %cst_8 : f32 to vector<1x256xf32>
      %c0_9 = arith.constant 0 : index
      %c0_10 = arith.constant 0 : index
      %16 = vector.load %arg10[%c0_9, %c0_10] : memref<1x256xf32, #tpu.memory_space<vmem>>, vector<1x256xf32>
      tpu.vector_store %arg10[%c0_9, %c0_10], %15 {strides = array<i32>} : memref<1x256xf32, #tpu.memory_space<vmem>>, vector<1x256xf32>,
      %cst_11 = arith.constant 0.000000e+00 : f32
      %17 = vector.broadcast %cst_11 : f32 to vector<1x256xf32>
      %c0_12 = arith.constant 0 : index
      %c0_13 = arith.constant 0 : index
      %18 = vector.load %arg11[%c0_12, %c0_13] : memref<1x256xf32, #tpu.memory_space<vmem>>, vector<1x256xf32>
      tpu.vector_store %arg11[%c0_12, %c0_13], %17 {strides = array<i32>} : memref<1x256xf32, #tpu.memory_space<vmem>>, vector<1x256xf32>,
    } else {
    }
    %c0_i32_5 = arith.constant 0 : i32
    %9 = arith.cmpi eq, %arg0, %c0_i32_5 : i32
    %10 = arith.extui %9 : i1 to i32
    %c0_i32_6 = arith.constant 0 : i32
    %11 = arith.cmpi ne, %10, %c0_i32_6 : i32
    scf.if %11 {
      %c0_8 = arith.constant 0 : index
      %c0_9 = arith.constant 0 : index
      %15 = vector.load %arg10[%c0_8, %c0_9] : memref<1x256xf32, #tpu.memory_space<vmem>>, vector<1x256xf32>
      %cst_10 = arith.constant dense<0.000000e+00> : vector<256xf32>
      %16 = vector.multi_reduction <add>, %3, %cst_10 [0] : vector<8x256xf32> to vector<256xf32>
      %17 = vector.shape_cast %16 : vector<256xf32> to vector<1x256xf32>
      %18 = arith.addf %15, %17 : vector<1x256xf32>
      %c0_11 = arith.constant 0 : index
      %c0_12 = arith.constant 0 : index
      %19 = vector.load %arg10[%c0_11, %c0_12] : memref<1x256xf32, #tpu.memory_space<vmem>>, vector<1x256xf32>
      tpu.vector_store %arg10[%c0_11, %c0_12], %18 {strides = array<i32>} : memref<1x256xf32, #tpu.memory_space<vmem>>, vector<1x256xf32>,
      %c0_13 = arith.constant 0 : index
      %c0_14 = arith.constant 0 : index
      %20 = vector.load %arg11[%c0_13, %c0_14] : memref<1x256xf32, #tpu.memory_space<vmem>>, vector<1x256xf32>
      %21 = arith.mulf %3, %3 : vector<8x256xf32>
      %cst_15 = arith.constant dense<0.000000e+00> : vector<256xf32>
      %22 = vector.multi_reduction <add>, %21, %cst_15 [0] : vector<8x256xf32> to vector<256xf32>
      %23 = vector.shape_cast %22 : vector<256xf32> to vector<1x256xf32>
      %24 = arith.addf %20, %23 : vector<1x256xf32>
      %c0_16 = arith.constant 0 : index
      %c0_17 = arith.constant 0 : index
      %25 = vector.load %arg11[%c0_16, %c0_17] : memref<1x256xf32, #tpu.memory_space<vmem>>, vector<1x256xf32>
      tpu.vector_store %arg11[%c0_16, %c0_17], %24 {strides = array<i32>} : memref<1x256xf32, #tpu.memory_space<vmem>>, vector<1x256xf32>,
    } else {
    }
    %c1_i32 = arith.constant 1 : i32
    %12 = arith.cmpi eq, %arg0, %c1_i32 : i32
    %13 = arith.extui %12 : i1 to i32
    %c0_i32_7 = arith.constant 0 : i32
    %14 = arith.cmpi ne, %13, %c0_i32_7 : i32
    scf.if %14 {
      %c0_8 = arith.constant 0 : index
      %c0_9 = arith.constant 0 : index
      %15 = vector.load %arg10[%c0_8, %c0_9] : memref<1x256xf32, #tpu.memory_space<vmem>>, vector<1x256xf32>
      %cst_10 = arith.constant 3.125000e-02 : f32
      %16 = vector.broadcast %cst_10 : f32 to vector<1x256xf32>
      %17 = arith.mulf %15, %16 : vector<1x256xf32>
      %c0_11 = arith.constant 0 : index
      %c0_12 = arith.constant 0 : index
      %18 = vector.load %arg11[%c0_11, %c0_12] : memref<1x256xf32, #tpu.memory_space<vmem>>, vector<1x256xf32>
      %cst_13 = arith.constant 3.125000e-02 : f32
      %19 = vector.broadcast %cst_13 : f32 to vector<1x256xf32>
      %20 = arith.mulf %18, %19 : vector<1x256xf32>
      %21 = arith.mulf %17, %17 : vector<1x256xf32>
      %22 = arith.subf %20, %21 : vector<1x256xf32>
      %cst_14 = arith.constant 0.000000e+00 : f32
      %23 = vector.broadcast %cst_14 : f32 to vector<1x256xf32>
      %24 = arith.maximumf %22, %23 : vector<1x256xf32>
      %cst_15 = arith.constant 9.99999974E-6 : f32
      %25 = vector.broadcast %cst_15 : f32 to vector<1x256xf32>
      %26 = arith.addf %24, %25 : vector<1x256xf32>
      %27 = math.rsqrt %26 : vector<1x256xf32>
      %c0_16 = arith.constant 0 : index
      %c0_17 = arith.constant 0 : index
      %28 = vector.load %arg4[%c0_16, %c0_17] : memref<1x256xf32, #tpu.memory_space<vmem>>, vector<1x256xf32>
      %29 = arith.mulf %28, %27 : vector<1x256xf32>
      %c0_18 = arith.constant 0 : index
      %c0_19 = arith.constant 0 : index
      %30 = vector.load %arg5[%c0_18, %c0_19] : memref<1x256xf32, #tpu.memory_space<vmem>>, vector<1x256xf32>
      %31 = arith.mulf %17, %29 : vector<1x256xf32>
      %32 = arith.subf %30, %31 : vector<1x256xf32>
      %33 = vector.broadcast %29 : vector<1x256xf32> to vector<8x256xf32>
      %34 = arith.mulf %3, %33 : vector<8x256xf32>
      %35 = vector.broadcast %32 : vector<1x256xf32> to vector<8x256xf32>
      %36 = arith.addf %34, %35 : vector<8x256xf32>
      %c0_20 = arith.constant 0 : index
      %c0_21 = arith.constant 0 : index
      %37 = vector.load %arg8[%c0_20, %c0_21] : memref<8x256xf32, #tpu.memory_space<vmem>>, vector<8x256xf32>
      tpu.vector_store %arg8[%c0_20, %c0_21], %36 {strides = array<i32>} : memref<8x256xf32, #tpu.memory_space<vmem>>, vector<8x256xf32>,
      %38 = arith.truncf %36 : vector<8x256xf32> to vector<8x256xbf16>
      %c0_22 = arith.constant 0 : index
      %c0_23 = arith.constant 0 : index
      %39 = vector.load %arg6[%c0_22, %c0_23] : memref<256x128xbf16, #tpu.memory_space<vmem>>, vector<256x128xbf16>
      %cst_24 = arith.constant dense<0.000000e+00> : vector<8x128xf32>
      %40 = tpu.matmul %38, %39, %cst_24 {dimension_numbers = #tpu.dot_dimension_numbers<[1], [0], [0], [1], [0, 0, 1, 1], [], []>} : vector<8x256xbf16>, vector<256x128xbf16>, vector<8x128xf32> -> vector<8x128xf32>
      %c0_25 = arith.constant 0 : index
      %c0_26 = arith.constant 0 : index
      %41 = vector.load %arg7[%c0_25, %c0_26] : memref<1x128xf32, #tpu.memory_space<vmem>>, vector<1x128xf32>
      %42 = vector.broadcast %41 : vector<1x128xf32> to vector<8x128xf32>
      %43 = arith.addf %40, %42 : vector<8x128xf32>
      %c0_27 = arith.constant 0 : index
      %c0_28 = arith.constant 0 : index
      %44 = vector.load %arg9[%c0_27, %c0_28] : memref<8x128xf32, #tpu.memory_space<vmem>>, vector<8x128xf32>
      tpu.vector_store %arg9[%c0_27, %c0_28], %43 {strides = array<i32>} : memref<8x128xf32, #tpu.memory_space<vmem>>, vector<8x128xf32>,
    } else {
    }
    return
  }
  func.func @transform_0(%arg0: i32, %arg1: i32) -> (i32, i32) {
    %c0_i32 = arith.constant 0 : i32
    %c0_i32_0 = arith.constant 0 : i32
    return %arg1, %c0_i32 : i32, i32
  }
  func.func @transform_1(%arg0: i32, %arg1: i32) -> (i32, i32) {
    %c0_i32 = arith.constant 0 : i32
    %c0_i32_0 = arith.constant 0 : i32
    %c0_i32_1 = arith.constant 0 : i32
    return %c0_i32, %c0_i32_0 : i32, i32
  }
  func.func @transform_2(%arg0: i32, %arg1: i32) -> (i32, i32) {
    %c0_i32 = arith.constant 0 : i32
    %c0_i32_0 = arith.constant 0 : i32
    %c0_i32_1 = arith.constant 0 : i32
    return %c0_i32, %c0_i32_0 : i32, i32
  }
  func.func @transform_3(%arg0: i32, %arg1: i32) -> (i32, i32) {
    %c0_i32 = arith.constant 0 : i32
    %c0_i32_0 = arith.constant 0 : i32
    %c0_i32_1 = arith.constant 0 : i32
    return %c0_i32, %c0_i32_0 : i32, i32
  }
  func.func @transform_4(%arg0: i32, %arg1: i32) -> (i32, i32) {
    %c0_i32 = arith.constant 0 : i32
    %c0_i32_0 = arith.constant 0 : i32
    %c0_i32_1 = arith.constant 0 : i32
    return %c0_i32, %c0_i32_0 : i32, i32
  }
  func.func @transform_5(%arg0: i32, %arg1: i32) -> (i32, i32) {
    %c0_i32 = arith.constant 0 : i32
    %c0_i32_0 = arith.constant 0 : i32
    %c0_i32_1 = arith.constant 0 : i32
    return %c0_i32, %c0_i32_0 : i32, i32
  }
  func.func @transform_6(%arg0: i32, %arg1: i32) -> (i32, i32) {
    %c0_i32 = arith.constant 0 : i32
    %c0_i32_0 = arith.constant 0 : i32
    return %arg1, %c0_i32 : i32, i32
  }
  func.func @transform_7(%arg0: i32, %arg1: i32) -> (i32, i32) {
    %c0_i32 = arith.constant 0 : i32
    %c0_i32_0 = arith.constant 0 : i32
    return %arg1, %c0_i32 : i32, i32
  }
}

</mosaic_0001>

<bundles_post_ra>
// kernel: tpu_custom_call.1
= control target key start
LH: loop header
LB: loop body
LE: loop exit
PB: predicated region body
PF: predicated region fallthrough
CT: control target
= control target key end

     0   :  { %s1797_s0 = inlined_call_operand.hbm [shape: f32[32,128], index: 0, kind: input, shape index: {}]   ;;  %s1798_s1 = inlined_call_operand.hbm [shape: bf16[128,256], index: 1, kind: input, shape index: {}]   ;;  %s1799_s2 = inlined_call_operand.vmem [shape: f32[1,256], index: 2, kind: input, shape index: {}]   ;;  %s1800_s3 = inlined_call_operand.vmem [shape: f32[1,256], index: 3, kind: input, shape index: {}]   ;;  %s1801_s4 = inlined_call_operand.hbm [shape: bf16[256,128], index: 4, kind: input, shape index: {}]   ;;  %s1802_s5 = inlined_call_operand.vmem [shape: f32[1,128], index: 5, kind: input, shape index: {}]   ;;  %s1803_s6 = inlined_call_operand.hbm [shape: f32[32,256], index: 6, kind: output, shape index: {0}]   ;;  %s1804_s7 = inlined_call_operand.hbm [shape: f32[32,128], index: 7, kind: output, shape index: {1}]  }
   0x1   :  { %1813 = sst [smem:[#allocation19_spill]] %s1797_s0 }
   0x2   :  { %1814 = sst [smem:[#allocation20_spill]] %s1798_s1 }
   0x3   :  { %1815 = sst [smem:[#allocation21_spill]] %s1803_s6 }
   0x4   :  { %1816 = sst [smem:[#allocation22_spill]] %s1804_s7 }
   0x5   :  { %13 = vsyncpa [#allocation5], 0 }
   0x6   :  { %15 = vsyncpa [#allocation5 + $0x1], 0 }
   0x7   :  { %16 = vsyncpa [#allocation8], 0 }
   0x8   :  { %17 = vsyncpa [#allocation6], 0 }
   0x9   :  { %19 = vsyncpa [#allocation6 + $0x1], 0 }
   0xa   :  { %20 = vsyncpa [#allocation12], 0 }
   0xb   :  { %22 = vsyncpa [#allocation12 + $0x1], 0  ;;  %s1468_s24 = smov 0   ;;  %s1470_s25 = smov 0  }
   0xc   :  { %s1472_s26 = smov 0   ;;  %s1474_s27 = smov 0  }
   0xd   :  { %s1476_s28 = smov 0   ;;  %s1478_s29 = smov 0  }
   0xe   :  { %s1480_s30 = smov 0   ;;  %s1482_s8 = smov 0  }
   0xf LB: > { %1817 = sst [smem:[#allocation17_spill]] %s1386_s24  ;;  %s962_s9 = sadd.s32 4294967295, %s1414_s8   ;;  %s1414_s8 = sphi %s1482_s8, %s28_s8   ;;  %s1410_s30 = sphi %s1480_s30, %s1845_s30   ;;  %s1406_s29 = sphi %s1478_s29, %s1844_s29   ;;  %s1402_s28 = sphi %s1476_s28, %s1843_s28   ;;  %s1398_s27 = sphi %s1474_s27, %s1842_s27   ;;  %s1394_s26 = sphi %s1472_s26, %s1841_s26   ;;  %s1390_s25 = sphi %s1470_s25, %s1840_s25   ;;  %s1386_s24 = sphi %s1468_s24, %s1839_s24  }
  0x10   : > { %s963_s10 = sadd.s32 4294967294, %s1414_s8   ;;  %p60_p0 = scmp.ne.s32.totalorder %s1390_s25, %s1386_s24 }
  0x11   : > { %p1512_p1 = scmp.eq.s32.totalorder %s962_s9, 0  ;;  %p1516_p2 = scmp.eq.s32.totalorder %s962_s9, 7 }
  0x12   : > { %p195_p3 = scmp.eq.s32.totalorder %s963_s10, 7  ;;  %p964_p5 = scmp.ge.s32.totalorder %s1414_s8, 1 }
  0x13   : > { %s1818_s11 = scalar_select %p1512_p1, 1, 0 }
  0x14   : > { %s1819_s12 = scalar_select %p1516_p2, 1, 0 }
  0x15   : > { %p1522_p4 = por %p1512_p1, %p60_p0  ;;  %p1527_p6 = por %p195_p3, %p60_p0 }
  0x16   : > { %p228_p7 = scmp.lt.s32.totalorder %s1414_s8, 9  ;;  %s1416_s16 = smov [#allocation7]  }
  0x17   : > { %s1820_s13 = scalar_select %p1522_p4, 1, 0 }
  0x18   : > { %s1821_s14 = scalar_select %p1527_p6, 1, 0 }
  0x19   : > { %p1532_p8 = pnand %p964_p5, %p228_p7  ;;  %s240_s17 = sshll.u32 %s1416_s16, 4  ;;  %s241_s17 = int_to_ptr.vmem [resolvable:$true] %s240_s17 }
  0x1a   : > { %1822 = sst [smem:[#allocation18_spill]] %s1821_s14  ;;  %s1417_s19 = smov [#allocation9]  }
  0x1b   : > { %s1823_s15 = scalar_select %p1532_p8, 1, 0 }
  0x1c   : > { %p1055_p9 = pneg %p1532_p8  ;;  %s259_s20 = sshll.u32 %s1417_s19, 4  ;;  %s1544_s20 = int_to_ptr.vmem [resolvable:$true] %s259_s20 }
  0x1d   : > { %s1825_s1 = sld [smem:[#allocation20_spill]] }
  0x1e   : > { %p1540_p10 = pnand %p1055_p9, %p1512_p1 }
  0x20   : > { %p1196_p12 = pneg %p1540_p10 }
  0x23   : > { %s1194_s23 = scalar_lea.hbm %s1825_s1, 2048 }
  0x24   : > { %p1195_p11 = scmp.ne.s32.totalorder %s1825_s1, %s1194_s23  ;;  %p1201_p3 = scmp.lt.u32.totalorder %s1194_s23, %s1825_s1 }
  0x26   : > { %p1197_p13 = pnand %p1196_p12, %p1195_p11 }
  0x28   : > { %p1198_p0 = pneg %p1197_p13 }
  0x2a   : > { %p1203_p5 = pnand %p1201_p3, %p1198_p0 }
  0x2c   : > { %1206 = shalt.err (!%p1203_p5)
}
  0x2d   : > { %s1207_s19 = scalar_lea.vmem %s241_s17, 2048  ;;  %p1215_p1 = scmp.lt.s32.totalorder %s241_s17, %s241_s17 }
  0x2e   : > { %p1208_p7 = scmp.ne.s32.totalorder %s241_s17, %s1207_s19  ;;  %p1216_p4 = scmp.lt.s32.totalorder %s1207_s19, %s1207_s19 }
  0x30   : > { %p1210_p9 = pnand %p1208_p7, %p1196_p12  ;;  %p1217_p8 = por %p1216_p4, %p1215_p1 }
  0x32   : > { %p1211_p6 = pneg %p1210_p9 }
  0x34   : > { %p1218_p2 = pnand %p1217_p8, %p1211_p6 }
  0x36   : > { %1221 = shalt.err (!%p1218_p2)
}
  0x37   : > { %s1418_s21 = smov 128   ;;  %s1419_s22 = smov 8  }
  0x38   : > { %1058 = dma.hbm_to_vmem [thread:$0]  (!%p1540_p10), %s1825_s1, 2048, %s241_s17, [#allocation8], %s1418_s21, %s1418_s21, %s1419_s22  }
  0x39   : > { %s1222_s16 = scalar_lea.hbm %s1801_s4, 2048 }
  0x3a   : > { %p1223_p11 = scmp.ne.s32.totalorder %s1801_s4, %s1222_s16  ;;  %p1229_p4 = scmp.lt.u32.totalorder %s1222_s16, %s1801_s4 }
  0x3c   : > { %p1225_p1 = pnand %p1223_p11, %p1196_p12 }
  0x3e   : > { %p1226_p2 = pneg %p1225_p1 }
  0x40   : > { %p1231_p6 = pnand %p1229_p4, %p1226_p2 }
  0x42   : > { %1234 = shalt.err (!%p1231_p6)
}
  0x43   : > { %s1235_s17 = scalar_lea.vmem %s1544_s20, 2048  ;;  %p1243_p3 = scmp.lt.s32.totalorder %s1544_s20, %s1544_s20 }
  0x44   : > { %p1236_p8 = scmp.ne.s32.totalorder %s1544_s20, %s1235_s17  ;;  %p1244_p5 = scmp.lt.s32.totalorder %s1235_s17, %s1235_s17 }
  0x46   : > { %p1238_p13 = pnand %p1236_p8, %p1196_p12  ;;  %p1245_p7 = por %p1244_p5, %p1243_p3 }
  0x48   : > { %p1239_p0 = pneg %p1238_p13 }
  0x4a   : > { %p1246_p9 = pnand %p1245_p7, %p1239_p0 }
  0x4c   : > { %1249 = shalt.err (!%p1246_p9)
}
  0x4d   : > { %s1420_s6 = smov 64   ;;  %s1421_s7 = smov 4  }
  0x4e   : > { %1061 = dma.hbm_to_vmem [thread:$0]  (!%p1540_p10), %s1801_s4, 2048, %s1544_s20, [#allocation8], %s1420_s6, %s1420_s6, %s1421_s7  }
  0x4f   : > { %s37_s22 = sadd.s32 1, %s1406_s29  ;;  %s40_s14 = sadd.s32 1, %s1410_s30 }
  0x50   : > { %p38_p12 = scmp.ge.s32.totalorder %s37_s22, 4  ;;  %s47_s23 = sadd.s32 1, %s1394_s26 }
  0x51   : > { %p54_p11 = scmp.ne.s32.totalorder %s1394_s26, %s1390_s25  ;;  %p55_p1 = scmp.eq.s32.totalorder %s1414_s8, 0 }
  0x52   : > { %s1847_s22 = smov (%p38_p12, %s37_s22), 0  ;;  %s1849_s14 = smov (!%p38_p12, %s40_s14), %s1410_s30 }
  0x53   : > { %s44_s9 = ssub.s32 %s1406_s29, %s1847_s22  ;;  %p1604_p2 = por %p55_p1, %p54_p11 }
  0x54   : > { %p42_p10 = scmp.ge.s32.totalorder %s1849_s14, 2  ;;  %p45_p4 = scmp.eq.s32.totalorder %s44_s9, 0 }
  0x55   : > { %p1827_p6 = scmp.ne.s32.totalorder %s1819_s12, 0  ;;  %p1075_p13 = scmp.lt.s32.totalorder %s1414_s8, 8 }
  0x56   : > { %s1851_s14 = smov (%p42_p10, %s1849_s14), 0  ;;  %s276_s16 = sand.u32 1, %s1394_s26  }
  0x57   : > { %p1610_p8 = por %p1827_p6, %p54_p11  ;;  %s969_s19 = sshll.u32 %s1406_s29, 7 }
  0x58   : > { %s1618_s10 = scalar_select %p45_p4, %s1394_s26, %s47_s23  }
  0x59   : > { %s968_s17 = sshll.u32 %s276_s16, 3  ;;  %s1829_s0 = sld [smem:[#allocation19_spill]] }
  0x5a   : > { %s280_s12 = scalar_lea.vmem [#allocation4], %s968_s17  ;;  %p1629_p0 = pnand %p1075_p13, %p1604_p2 }
  0x5b   : > { %s287_s21 = sshll.u32 %s280_s12, 4  ;;  %s277_s23 = scalar_lea.sflag [#allocation5], %s276_s16  ;;  %s1633_s21 = int_to_ptr.vmem [resolvable:$true] %s287_s21 }
  0x5c   : > { %p1252_p5 = pneg %p1629_p0 }
  0x5f   : > { %s1625_s24 = scalar_lea.hbm %s1829_s0, %s969_s19  ;;  %s1255_s18 = scalar_lea.hbm %s1829_s0, 512 }
  0x60   : > { %s1250_s1 = scalar_lea.hbm %s1625_s24, 128  ;;  %p1256_p12 = scmp.lt.u32.totalorder %s1625_s24, %s1829_s0 }
  0x61   : > { %p1251_p3 = scmp.ne.s32.totalorder %s1625_s24, %s1250_s1  ;;  %p1257_p11 = scmp.lt.u32.totalorder %s1255_s18, %s1250_s1 }
  0x62   : > { %p1259_p2 = scmp.lt.u32.totalorder %s1250_s1, %s1625_s24 }
  0x63   : > { %p1253_p7 = pnand %p1252_p5, %p1251_p3  ;;  %p1258_p1 = por %p1257_p11, %p1256_p12 }
  0x65   : > { %p1254_p9 = pneg %p1253_p7  ;;  %p1260_p10 = por %p1259_p2, %p1258_p1 }
  0x67   : > { %p1261_p4 = pnand %p1260_p10, %p1254_p9 }
  0x69   : > { %1264 = shalt.err (!%p1261_p4)
}
  0x6a   : > { %s1265_s16 = scalar_lea.vmem %s1633_s21, 128  ;;  %s1422_s12 = smov [#allocation4]  }
  0x6b   : > { %p1266_p6 = scmp.ne.s32.totalorder %s1633_s21, %s1265_s16  ;;  %s1270_s19 = sshll.u32 %s1422_s12, 4  ;;  %s1271_s19 = int_to_ptr.vmem [resolvable:$false] %s1270_s19 }
  0x6c   : > { %s1272_s17 = scalar_lea.vmem %s1271_s19, 256  ;;  %p1273_p7 = scmp.lt.s32.totalorder %s1633_s21, %s1271_s19 }
  0x6d   : > { %p1268_p13 = pnand %p1266_p6, %p1252_p5  ;;  %p1274_p12 = scmp.lt.s32.totalorder %s1272_s17, %s1265_s16 }
  0x6f   : > { %p1269_p3 = pneg %p1268_p13  ;;  %p1275_p11 = por %p1274_p12, %p1273_p7 }
  0x71   : > { %p1276_p1 = pnand %p1275_p11, %p1269_p3 }
  0x73   : > { %1279 = shalt.err (!%p1276_p1)
}
  0x74   : > { %1065 = dma.hbm_to_vmem [thread:$0]  (!%p1629_p0), %s1625_s24, 128, %s1633_s21, %s277_s23  }
  0x75   : > { %p1831_p9 = scmp.ne.s32.totalorder %s1823_s15, 0 }
  0x76   : > { %s1663_s1 = sand.u32 (!%p1831_p9), 1, %s1390_s25   ;;  %p1832_p5 = scmp.ne.s32.totalorder (!%p1831_p9), %s1820_s13, 0 }
  0x77   : > { %296 = sbr.rel (%p1831_p9) target bundleno = 709 (0x2c5), region = 44  ;;  %s971_s18 = sshll.u32 (!%p1831_p9), %s1663_s1, 3 }
  0x78   : > { %s299_s6 = scalar_lea.sflag (!%p1831_p9), [#allocation5], %s1663_s1  ;;  %s1669_s7 = scalar_lea.vmem (!%p1831_p9), [#allocation4], %s971_s18 }
  0x7e   : > { %1369 = dma.done.wait (%p1832_p5), %s299_s6, 128  }
  0x7f   : > { %1371 = vsyncadd (%p1832_p5), %s299_s6, 4294967168  ;;  %p1833_p0 = scmp.ne.s32.totalorder %s1818_s11, 0 }
  0x81   : > { %1373 = dma.done.wait (%p1833_p0), [#allocation8], 4096  }
  0x82   : > { %1375 = vsyncadd (%p1833_p0), [#allocation8], 4294963200  ;;  %s974_s15 = sshll.u32 %s1663_s1, 4  ;;  %v1423_v0 = vmov 0   ;;  %v1152_v1 = vld [vmem:[#allocation7 + $0x4] ss:$8 sps:$4 sm:$0xff]  }
  0x83   : > { %477 = vmatprep.mubr.bf16.mxu0 %v1423_v0  ;;  %v1154_v2 = vld [vmem:[#allocation7] ss:$8 sps:$4 sm:$0xff]   ;;  %445 = vmatprep.subr.bf16.mxu0 %v1152_v1  ;;  %v1155_v3 = vld [vmem:[#allocation7 + $0x14] ss:$8 sps:$4 sm:$0xff]   ;;  %v1157_v4 = vld [vmem:[#allocation7 + $0x10] ss:$8 sps:$4 sm:$0xff]  }
  0x84   : > { %446 = vmatpush1.bf16.msra.mxu0 %v1154_v2  ;;  %v1158_v5 = vld [vmem:[#allocation7 + $0x24] ss:$8 sps:$4 sm:$0xff]   ;;  %v1160_v6 = vld [vmem:[#allocation7 + $0x20] ss:$8 sps:$4 sm:$0xff]   ;;  %v1161_v7 = vld [vmem:[#allocation7 + $0x34] ss:$8 sps:$4 sm:$0xff]  }
  0x85   : > { %447 = vmatprep.subr.bf16.mxu0 %v1155_v3  ;;  %v1163_v8 = vld [vmem:[#allocation7 + $0x30] ss:$8 sps:$4 sm:$0xff]   ;;  %v1164_v9 = vld [vmem:[#allocation7 + $0x44] ss:$8 sps:$4 sm:$0xff]   ;;  %v1166_v10 = vld [vmem:[#allocation7 + $0x40] ss:$8 sps:$4 sm:$0xff]  }
  0x86   : > { %v1167_v11 = vld [vmem:[#allocation7 + $0x54] ss:$8 sps:$4 sm:$0xff]   ;;  %v1169_v12 = vld [vmem:[#allocation7 + $0x50] ss:$8 sps:$4 sm:$0xff]   ;;  %v1170_v13 = vld [vmem:[#allocation7 + $0x64] ss:$8 sps:$4 sm:$0xff]  }
  0x87   : > { %v1172_v14 = vld [vmem:[#allocation7 + $0x60] ss:$8 sps:$4 sm:$0xff]   ;;  %v1173_v15 = vld [vmem:[#allocation7 + $0x74] ss:$8 sps:$4 sm:$0xff]   ;;  %v1175_v16 = vld [vmem:[#allocation7 + $0x70] ss:$8 sps:$4 sm:$0xff]  }
  0x88   : > { %448 = vmatpush1.bf16.msra.mxu0 %v1157_v4  ;;  %v347_v17 = vld [vmem:[%s1669_s7] sm:$0xff]  ;;  %p486_p2 = scmp.eq.s32.totalorder %s1402_s28, 0  ;;  %p487_p10 = scmp.eq.s32.totalorder %s1398_s27, 0 }
  0x89   : > { %449 = vmatprep.subr.bf16.mxu0 %v1158_v5  ;;  %v348_v18 = vpack.c.bf16 %v347_v17, %v347_v17  ;;  %s1689_s11 = scalar_lea.vmem [#allocation10], %s974_s15  ;;  %s1693_s13 = scalar_lea.vmem [#allocation11], %s971_s18 }
  0x8a   : > { %p488_p4 = pnand %p487_p10, %p486_p2 }
  0x8b   : > { %v492_v23 = vlaneseq (!%p488_p4)  ;;  %v1424_v24 = vmov (!%p488_p4), 0.0  }
  0x8c   : > { %450 = vmatpush1.bf16.msra.mxu0 %v1160_v6 }
  0x8d   : > { %451 = vmatprep.subr.bf16.mxu0 %v1161_v7  ;;  %vm494_vm0 = vcmp.lt.s32.totalorder (!%p488_p4), %v492_v23, 256 }
  0x8e   : > { %496 = vst.msk [vmem:[#allocation2] sm:$0x3] (!%p488_p4), %vm494_vm0, %v1424_v24  ;;  %497 = vst.msk [vmem:[#allocation3] sm:$0x3] (!%p488_p4), %vm494_vm0, %v1424_v24 }
  0x90   : > { %452 = vmatpush1.bf16.msra.mxu0 %v1163_v8 }
  0x91   : > { %453 = vmatprep.subr.bf16.mxu0 %v1164_v9 }
  0x94   : > { %454 = vmatpush1.bf16.msra.mxu0 %v1166_v10 }
  0x95   : > { %455 = vmatprep.subr.bf16.mxu0 %v1167_v11 }
  0x98   : > { %456 = vmatpush1.bf16.msra.mxu0 %v1169_v12 }
  0x99   : > { %457 = vmatprep.subr.bf16.mxu0 %v1170_v13 }
  0x9c   : > { %458 = vmatpush1.bf16.msra.mxu0 %v1172_v14 }
  0x9d   : > { %459 = vmatprep.subr.bf16.mxu0 %v1173_v15 }
  0xa0   : > { %460 = vmatpush1.bf16.msra.mxu0 %v1175_v16 }
  0xa3   : > { %478 = vmatmul.mubr.bf16.vlgmr.msra.gmra.mrb[0].mxu0 %v348_v18 }
 0x173   : > { %491 = sbr.rel (%p488_p4) target bundleno = 378 (0x17a), region = 60 }
 0x176   : > { %v1683_v19 = vpop.f32.mrb[0].mxu0 }
 0x177   : > { %v1685_v20 = vpop.f32.mrb[1].mxu0 }
 0x178   : > { %v483_v21 = vpop.f32.mrb[2].mxu0 }
 0x179   : > { %v484_v22 = vpop.f32.mrb[3].mxu0 }
 0x17a PF: > { %p992_p6 = scmp.ne.s32.totalorder %s1402_s28, 0 }
 0x17b   : > { %v502_v25 = vrot.slane (!%p992_p6), %v1683_v19, 4  ;;  %v508_v26 = vrot.slane (!%p992_p6), %v1685_v20, 4  ;;  %v539_v27 = vmul.f32 (!%p992_p6), %v1683_v19, %v1683_v19  ;;  %v540_v28 = vmul.f32 (!%p992_p6), %v1685_v20, %v1685_v20  ;;  %v501_v59 = vld [vmem:[#allocation2] sm:$0x3] (!%p992_p6)  ;;  %v538_v0 = vld [vmem:[#allocation3] sm:$0x3] (!%p992_p6) }
 0x17c   : > { %500 = sbr.rel (%p992_p6) target bundleno = 403 (0x193), region = 64  ;;  %v1425_v31 = vmov (!%p992_p6), 1966171168   ;;  %v520_v33 = vlaneseq (!%p992_p6) }
 0x17d   : > { %v503_v29 = vadd.f32 (!%p992_p6), %v502_v25, %v1683_v19  ;;  %v509_v30 = vadd.f32 (!%p992_p6), %v508_v26, %v1685_v20  ;;  %v518_v32 = vunpack.c.l.s4 (!%p992_p6), %v1425_v31  ;;  %v541_v34 = vrot.slane (!%p992_p6), %v539_v27, 4 }
 0x17e   : > { %v547_v35 = vrot.slane (!%p992_p6), %v540_v28, 4  ;;  %v521_v43 = vshrl.u32 (!%p992_p6), %v520_v33, 7  ;;  %vm535_vm1 = vcmp.lt.s32.totalorder (!%p992_p6), %v520_v33, 256 }
 0x17f   : > { %v504_v36 = vrot.slane (!%p992_p6), %v503_v29, 2  ;;  %v510_v37 = vrot.slane (!%p992_p6), %v509_v30, 2  ;;  %v542_v38 = vadd.f32 (!%p992_p6), %v541_v34, %v539_v27  ;;  %v519_v42 = vunpack.c.0.s8 (!%p992_p6), %v518_v32 }
 0x180   : > { %v548_v39 = vadd.f32 (!%p992_p6), %v547_v35, %v540_v28 }
 0x181   : > { %v505_v40 = vadd.f32 (!%p992_p6), %v504_v36, %v503_v29  ;;  %v511_v41 = vadd.f32 (!%p992_p6), %v510_v37, %v509_v30  ;;  %v543_v44 = vrot.slane (!%p992_p6), %v542_v38, 2  ;;  %v522_v52 = vsub.s32 (!%p992_p6), %v519_v42, %v521_v43 }
 0x182   : > { %v549_v45 = vrot.slane (!%p992_p6), %v548_v39, 2 }
 0x183   : > { %v506_v46 = vrot.slane %v505_v40, 1  ;;  %v512_v47 = vrot.slane %v511_v41, 1  ;;  %v544_v48 = vadd.f32 %v543_v44, %v542_v38 }
 0x184   : > { %v550_v49 = vadd.f32 %v549_v45, %v548_v39 }
 0x185   : > { %v507_v50 = vadd.f32 %v506_v46, %v505_v40  ;;  %v513_v51 = vadd.f32 %v512_v47, %v511_v41  ;;  %v545_v53 = vrot.slane %v544_v48, 1 }
 0x186   : > { %v551_v54 = vrot.slane %v550_v49, 1 }
 0x187   : > { %v516_v55 = vcombine.low %v507_v50, %v513_v51  ;;  %v546_v56 = vadd.f32 %v545_v53, %v544_v48 }
 0x188   : > { %v552_v57 = vadd.f32 %v551_v54, %v550_v49 }
 0x189   : > { %v523_v58 = vrot.slane %v516_v55, %v522_v52 }
 0x18a   : > { %v555_v60 = vcombine.low %v546_v56, %v552_v57 }
 0x18b   : > { %v530_v61 = vrot.slane %v523_v58, %v522_v52 }
 0x18c   : > { %v562_v62 = vrot.slane %v555_v60, %v522_v52 }
 0x18d   : > { %v532_v63 = vadd.f32 %v530_v61, %v501_v59 }
 0x18e   : > { %v569_v1 = vrot.slane %v562_v62, %v522_v52 }
 0x18f   : > { %537 = vst.msk [vmem:[#allocation2] sm:$0x3] %vm535_vm1, %v532_v63 }
 0x190   : > { %v571_v2 = vadd.f32 %v569_v1, %v538_v0 }
 0x192   : > { %572 = vst.msk [vmem:[#allocation3] sm:$0x3] %vm535_vm1, %v571_v2 }
 0x193 PF: > { %p993_p13 = scmp.ne.s32.totalorder %s1402_s28, 1 }
 0x194   : > { %v1176_v3 = vld [vmem:[#allocation9 + $0x40] sm:$0xff] (!%p993_p13)   ;;  %v1178_v5 = vld [vmem:[#allocation9 + $0x48] sm:$0xff] (!%p993_p13)   ;;  %v1180_v7 = vld [vmem:[#allocation9 + $0x50] sm:$0xff] (!%p993_p13)   ;;  %v592_v29 = vlaneseq (!%p993_p13) }
 0x195   : > { %576 = sbr.rel (%p993_p13) target bundleno = 660 (0x294), region = 68  ;;  %v1177_v4 = vld [vmem:[#allocation9] sm:$0xff] (!%p993_p13)   ;;  %1019 = vmatprep.subr.bf16.mxu0 (!%p993_p13), %v1176_v3  ;;  %v1179_v6 = vld [vmem:[#allocation9 + $0x8] sm:$0xff] (!%p993_p13)   ;;  %v1181_v8 = vld [vmem:[#allocation9 + $0x10] sm:$0xff] (!%p993_p13)  }
 0x196   : > { %1020 = vmatpush3.bf16.msra.mxu0 (!%p993_p13), %v1177_v4  ;;  %v1182_v9 = vld [vmem:[#allocation9 + $0x58] sm:$0xff] (!%p993_p13)   ;;  %v1184_v11 = vld [vmem:[#allocation9 + $0x60] sm:$0xff] (!%p993_p13)   ;;  %v1186_v13 = vld [vmem:[#allocation9 + $0x68] sm:$0xff] (!%p993_p13)   ;;  %v593_v30 = vshrl.u32 (!%p993_p13), %v592_v29, 7 }
 0x197   : > { %1021 = vmatprep.subr.bf16.mxu0 (!%p993_p13), %v1178_v5  ;;  %v1183_v10 = vld [vmem:[#allocation9 + $0x18] sm:$0xff] (!%p993_p13)   ;;  %v1185_v12 = vld [vmem:[#allocation9 + $0x20] sm:$0xff] (!%p993_p13)   ;;  %v577_v14 = vld [vmem:[#allocation2] sm:$0x3] (!%p993_p13) }
 0x198   : > { %v578_v16 = vmul.f32 (!%p993_p13), 0.03125, %v577_v14  ;;  %v1187_v18 = vld [vmem:[#allocation9 + $0x28] sm:$0xff] (!%p993_p13)   ;;  %v1188_v22 = vld [vmem:[#allocation9 + $0x70] sm:$0xff] (!%p993_p13)   ;;  %v1190_v26 = vld [vmem:[#allocation9 + $0x78] sm:$0xff] (!%p993_p13)   ;;  %v598_v32 = vsub.s32 (!%p993_p13), 1, %v593_v30  ;;  %v594_v33 = vsub.s32 (!%p993_p13), 0, %v593_v30 }
 0x199   : > { %v579_v15 = vld [vmem:[#allocation3] sm:$0x3] (!%p993_p13)  ;;  %v1189_v24 = vld [vmem:[#allocation9 + $0x30] sm:$0xff] (!%p993_p13)   ;;  %v1191_v28 = vld [vmem:[#allocation9 + $0x38] sm:$0xff] (!%p993_p13)  }
 0x19a   : > { %1022 = vmatpush3.bf16.msra.mxu0 (!%p993_p13), %v1179_v6  ;;  %v580_v17 = vmul.f32 (!%p993_p13), 0.03125, %v579_v15  ;;  %v581_v21 = vmul.f32 (!%p993_p13), %v578_v16, %v578_v16  ;;  %v586_v31 = vld [vmem:[%s1799_s2] sm:$0x3] (!%p993_p13) }
 0x19b   : > { %1023 = vmatprep.subr.bf16.mxu0 (!%p993_p13), %v1180_v7  ;;  %v588_v36 = vld [vmem:[%s1800_s3] sm:$0x3] (!%p993_p13) }
 0x19c   : > { %v582_v23 = vsub.f32 %v580_v17, %v581_v21  ;;  %v994_v50 = vld [vmem:[%s1802_s5] ss:$0 sm:$0xff] }
 0x19e   : > { %1024 = vmatpush3.bf16.msra.mxu0 %v1181_v8  ;;  %v583_v25 = vmax.f32 %v582_v23, 0.0 }
 0x19f   : > { %1025 = vmatprep.subr.bf16.mxu0 %v1182_v9 }
 0x1a0   : > { %v584_v27 = vadd.f32 1e-05, %v583_v25 }
 0x1a2   : > { %1026 = vmatpush3.bf16.msra.mxu0 %v1183_v10  ;;  %1192 = vrsqrt.f32 %v584_v27 }
 0x1a3   : > { %1027 = vmatprep.subr.bf16.mxu0 %v1184_v11 }
 0x1a6   : > { %1028 = vmatpush3.bf16.msra.mxu0 %v1185_v12 }
 0x1a7   : > { %1029 = vmatprep.subr.bf16.mxu0 %v1186_v13 }
 0x1aa   : > { %1030 = vmatpush3.bf16.msra.mxu0 %v1187_v18 }
 0x1ab   : > { %1031 = vmatprep.subr.bf16.mxu0 %v1188_v22 }
 0x1ac   : > { %v1193_v34 = vpop.eup %1192 }
 0x1ad   : > { %v587_v35 = vmul.f32 %v1193_v34, %v586_v31 }
 0x1ae   : > { %1032 = vmatpush3.bf16.msra.mxu0 %v1189_v24 }
 0x1af   : > { %1033 = vmatprep.subr.bf16.mxu0 %v1190_v26  ;;  %v589_v37 = vmul.f32 %v587_v35, %v578_v16  ;;  %v599_v38 = vrot.slane %v587_v35, %v598_v32  ;;  %v595_v39 = vrot.slane %v587_v35, %v594_v33 }
 0x1b1   : > { %v590_v40 = vsub.f32 %v588_v36, %v589_v37  ;;  %v603_v41 = vmul.f32 %v599_v38, %v1685_v20  ;;  %v602_v42 = vmul.f32 %v595_v39, %v1683_v19 }
 0x1b2   : > { %1034 = vmatpush3.bf16.msra.mxu0 %v1191_v28 }
 0x1b3   : > { %v612_v43 = vrot.slane %v590_v40, %v598_v32  ;;  %v608_v44 = vrot.slane %v590_v40, %v594_v33 }
 0x1b5   : > { %v616_v45 = vadd.f32 %v612_v43, %v603_v41  ;;  %v615_v46 = vadd.f32 %v608_v44, %v602_v42 }
 0x1b7   : > { %618 = vst [vmem:[%s1689_s11 + $0x8] sm:$0xff] %v616_v45  ;;  %v620_v47 = vpack.c.bf16 %v616_v45, %v616_v45  ;;  %617 = vst [vmem:[%s1689_s11] sm:$0xff] %v615_v46  ;;  %v619_v48 = vpack.c.bf16 %v615_v46, %v615_v46 }
 0x1b9   : > { %788 = vmatprep.mubr.bf16.mxu0 %v620_v47 }
 0x1ba   : > { %789 = vmatmul.mubr.bf16.vlgmr.msra.gmra.mrb[0].mxu0 %v619_v48 }
 0x28d   : > { %v1035_v49 = vpop.f32.mrb[0].mxu0 }
 0x28e   : > { %v1036_v51 = vpop.f32.mrb[1].mxu0 }
 0x28f   : > { %v1037_v20 = vadd.f32 %v1036_v51, %v1035_v49  ;;  %v1038_v52 = vpop.f32.mrb[2].mxu0 }
 0x290   : > { %v1039_v19 = vpop.f32.mrb[3].mxu0 }
 0x291   : > { %v791_v53 = vadd.f32 %v1037_v20, %v994_v50 }
 0x293   : > { %796 = vst [vmem:[%s1693_s13] sm:$0xff] %v791_v53 }
 0x294 PF: > { %s1018_s12 = sshll.u32 %s1398_s27, 8  ;;  %s1834_s18 = sld [smem:[#allocation21_spill]] }
 0x295   : > { %s817_s7 = sshll.u32 %s1689_s11, 4  ;;  %s798_s15 = scalar_lea.sflag [#allocation6], %s1663_s1  ;;  %s818_s7 = int_to_ptr.vmem [resolvable:$true] %s817_s7 }
 0x296   : > { %s1280_s28 = scalar_lea.vmem %s818_s7, 256  ;;  %s1426_s24 = smov [#allocation10]  }
 0x297   : > { %p1281_p3 = scmp.ne.s32.totalorder %s818_s7, %s1280_s28  ;;  %s1284_s21 = sshll.u32 %s1426_s24, 4  ;;  %s1285_s21 = int_to_ptr.vmem [resolvable:$false] %s1284_s21 }
 0x298   : > { %s1286_s9 = scalar_lea.vmem %s1285_s21, 512  ;;  %p1287_p11 = scmp.lt.s32.totalorder %s818_s7, %s1285_s21 }
 0x299   : > { %p1282_p7 = pnand %p1281_p3, %p1610_p8  ;;  %p1288_p1 = scmp.lt.s32.totalorder %s1286_s9, %s1280_s28 }
 0x29a   : > { %s1723_s6 = scalar_lea.hbm %s1834_s18, %s1018_s12 }
 0x29b   : > { %p1283_p12 = pneg %p1282_p7  ;;  %p1289_p9 = por %p1288_p1, %p1287_p11 }
 0x29d   : > { %p1290_p5 = pnand %p1289_p9, %p1283_p12 }
 0x29f   : > { %1293 = shalt.err (!%p1290_p5)
}
 0x2a0   : > { %s1294_s11 = scalar_lea.hbm %s1723_s6, 256  ;;  %s1298_s12 = scalar_lea.hbm %s1834_s18, 1024 }
 0x2a1   : > { %p1295_p0 = scmp.ne.s32.totalorder %s1723_s6, %s1294_s11  ;;  %p1299_p4 = scmp.lt.u32.totalorder %s1723_s6, %s1834_s18 }
 0x2a2   : > { %p1300_p6 = scmp.lt.u32.totalorder %s1298_s12, %s1294_s11  ;;  %p1302_p3 = scmp.lt.u32.totalorder %s1294_s11, %s1723_s6 }
 0x2a3   : > { %p1296_p2 = pnand %p1295_p0, %p1610_p8 }
 0x2a4   : > { %p1301_p13 = por %p1300_p6, %p1299_p4 }
 0x2a5   : > { %p1297_p10 = pneg %p1296_p2 }
 0x2a6   : > { %p1303_p7 = por %p1302_p3, %p1301_p13 }
 0x2a8   : > { %p1304_p12 = pnand %p1303_p7, %p1297_p10 }
 0x2aa   : > { %1307 = shalt.err (!%p1304_p12)
}
 0x2ab   : > { %1051 = dma.vmem_to_hbm [thread:$0]  (%p1610_p8), %s818_s7, 256, %s1723_s6, %s798_s15  }
 0x2ac   : > { %s1015_s28 = sshll.u32 %s1398_s27, 7  ;;  %s830_s24 = sshll.u32 %s1693_s13, 4  ;;  %s831_s24 = int_to_ptr.vmem [resolvable:$true] %s830_s24 }
 0x2ad   : > { %s1835_s23 = sld [smem:[#allocation22_spill]]  ;;  %s803_s11 = scalar_lea.sflag [#allocation12], %s1663_s1 }
 0x2ae   : > { %s1308_s12 = scalar_lea.vmem %s831_s24, 128  ;;  %s1427_s19 = smov [#allocation11]  }
 0x2af   : > { %p1309_p11 = scmp.ne.s32.totalorder %s831_s24, %s1308_s12  ;;  %s1312_s17 = sshll.u32 %s1427_s19, 4  ;;  %s1313_s17 = int_to_ptr.vmem [resolvable:$false] %s1312_s17 }
 0x2b0   : > { %s1314_s0 = scalar_lea.vmem %s1313_s17, 256  ;;  %p1315_p5 = scmp.lt.s32.totalorder %s831_s24, %s1313_s17 }
 0x2b1   : > { %p1310_p1 = pnand %p1309_p11, %p1610_p8  ;;  %p1316_p0 = scmp.lt.s32.totalorder %s1314_s0, %s1308_s12 }
 0x2b3   : > { %s1749_s16 = scalar_lea.hbm %s1835_s23, %s1015_s28  ;;  %p1311_p9 = pneg %p1310_p1 }
 0x2b4   : > { %p1317_p2 = por %p1316_p0, %p1315_p5 }
 0x2b6   : > { %p1318_p10 = pnand %p1317_p2, %p1311_p9 }
 0x2b8   : > { %1321 = shalt.err (!%p1318_p10)
}
 0x2b9   : > { %s1322_s27 = scalar_lea.hbm %s1749_s16, 128  ;;  %s1326_s6 = scalar_lea.hbm %s1835_s23, 512 }
 0x2ba   : > { %p1323_p4 = scmp.ne.s32.totalorder %s1749_s16, %s1322_s27  ;;  %p1327_p3 = scmp.lt.u32.totalorder %s1749_s16, %s1835_s23 }
 0x2bb   : > { %p1328_p7 = scmp.lt.u32.totalorder %s1326_s6, %s1322_s27  ;;  %p1330_p11 = scmp.lt.u32.totalorder %s1322_s27, %s1749_s16 }
 0x2bc   : > { %p1324_p6 = pnand %p1323_p4, %p1610_p8 }
 0x2bd   : > { %p1329_p12 = por %p1328_p7, %p1327_p3 }
 0x2be   : > { %p1325_p13 = pneg %p1324_p6 }
 0x2bf   : > { %p1331_p1 = por %p1330_p11, %p1329_p12 }
 0x2c1   : > { %p1332_p9 = pnand %p1331_p1, %p1325_p13 }
 0x2c3   : > { %1335 = shalt.err (!%p1332_p9)
}
 0x2c4   : > { %1052 = dma.vmem_to_hbm [thread:$0]  (%p1610_p8), %s831_s24, 128, %s1749_s16, %s803_s11  }
 0x2c5 PF: > { %s1836_s0 = sld [smem:[#allocation17_spill]]  ;;  %s1837_s28 = sld [smem:[#allocation18_spill]] }
 0x2c6   : > { %p1078_p5 = scmp.ge.s32.totalorder %s1414_s8, 2 }
 0x2cb   : > { %s842_s21 = sand.u32 1, %s1836_s0   ;;  %p1838_p0 = scmp.ne.s32.totalorder %s1837_s28, 0 }
 0x2cc   : > { %s843_s9 = scalar_lea.sflag [#allocation6], %s842_s21 }
 0x2cd   : > { %p1067_p2 = pnand %p1078_p5, %p1838_p0 }
 0x2cf   : > { %1377 = dma.done.wait (!%p1067_p2), %s843_s9, 256  }
 0x2d0   : > { %1379 = vsyncadd (!%p1067_p2), %s843_s9, 4294967040  ;;  %s852_s12 = scalar_lea.sflag [#allocation12], %s842_s21 }
 0x2d1   : > { %1381 = dma.done.wait (!%p1067_p2), %s852_s12, 128  }
 0x2d2   : > { %1383 = vsyncadd (!%p1067_p2), %s852_s12, 4294967168  ;;  %s28_s8 = sadd.s32 1, %s1414_s8   ;;  %s1839_s24 = smov %s1390_s25 }
 0x2d3   : > { %p25_p10 = scmp.ge.s32.totalorder %s28_s8, 10   ;;  %s1840_s25 = smov %s1394_s26 }
 0x2d4   : > { %s1841_s26 = smov %s1618_s10  ;;  %s1842_s27 = smov %s1406_s29 }
 0x2d5   : > { %s1843_s28 = smov %s1410_s30  ;;  %s1844_s29 = smov %s1847_s22 }
 0x2d6   : > { %s1845_s30 = smov %s1851_s14  ;;  %27 = sbr.rel (!%p25_p10) target bundleno = 15 (0xf), region = 126 }
 0x2dd   :  { %857 = vsyncpa [#allocation5], 1 }
 0x2de   :  { %859 = vsyncpa [#allocation5 + $0x1], 1 }
 0x2df   :  { %860 = vsyncpa [#allocation8], 1 }
 0x2e0   :  { %861 = vsyncpa [#allocation6], 1 }
 0x2e1   :  { %863 = vsyncpa [#allocation6 + $0x1], 1 }
 0x2e2   :  { %864 = vsyncpa [#allocation12], 1 }
 0x2e3   :  { %866 = vsyncpa [#allocation12 + $0x1], 1 }

</bundles_post_ra>
